<compile_context>
chip_gen: v6e
topology: v6e:2x2x1
jax: 0.10.0
libtpu: 0.0.40
codegen_flags: <defaults>
</compile_context>

<pallas_src>
import jax
import jax.numpy as jnp
from jax.experimental import pallas as pl
from jax.experimental.pallas import tpu as pltpu

_LANE = 128
_SUBLANE = 8


def _vmem_capacity_bytes():
    """Per-TensorCore VMEM capacity, with a conservative fallback (v7x size)."""
    try:
        return int(pltpu.get_tpu_info().vmem_capacity_bytes)
    except Exception:
        return 64 * 1024 * 1024


def _round_down(v, m):
    return (v // m) * m


def _round_up(v, m):
    return -(-v // m) * m


# ---------------------------------------------------------------------------
# Path 1: whole reduction axis (N) resident in one block.
# ---------------------------------------------------------------------------
def _softmax_dim0_resident_kernel(x_ref, o_ref):
    x = x_ref[...].astype(jnp.float32)
    m = jnp.max(x, axis=0, keepdims=True)          # XLU sublane reduce
    e = jnp.exp(x - m)                              # EUP transcendentals
    denom = jnp.sum(e, axis=0, keepdims=True)
    inv = pl.reciprocal(denom, approx=True)         # EUP recip + Newton step
    inv = inv * (2.0 - denom * inv)
    o_ref[...] = (e * inv).astype(o_ref.dtype)


# ---------------------------------------------------------------------------
# Path 2: stream over N (two passes, online-softmax statistics).
# ---------------------------------------------------------------------------
def _softmax_dim0_stats_kernel(x_ref, m_ref, d_ref):
    i = pl.program_id(1)

    @pl.when(i == 0)
    def _():
        m_ref[...] = jnp.full(m_ref.shape, jnp.finfo(jnp.float32).min,
                              jnp.float32)
        d_ref[...] = jnp.zeros(d_ref.shape, jnp.float32)

    x = x_ref[...].astype(jnp.float32)
    m_prev = m_ref[...]
    m_new = jnp.maximum(m_prev, jnp.max(x, axis=0, keepdims=True))
    d_ref[...] = (d_ref[...] * jnp.exp(m_prev - m_new)
                  + jnp.sum(jnp.exp(x - m_new), axis=0, keepdims=True))
    m_ref[...] = m_new


def _softmax_dim0_normalize_kernel(x_ref, m_ref, d_ref, o_ref):
    x = x_ref[...].astype(jnp.float32)
    denom = d_ref[...]
    inv = pl.reciprocal(denom, approx=True)
    inv = inv * (2.0 - denom * inv)
    o_ref[...] = (jnp.exp(x - m_ref[...]) * inv).astype(o_ref.dtype)


# ---------------------------------------------------------------------------
# Tile planning.
# ---------------------------------------------------------------------------
def _plan(N, D, in_itemsize, out_itemsize, budget, tile_n, tile_d,
          force_streaming):
    Dp = _round_up(D, _LANE)
    f32_temps = 3 * 4  # ~3 live f32 intermediates per element (x, e, scaled)
    per_elem = 2 * in_itemsize + 2 * out_itemsize + f32_temps  # dbl-buffered io

    # --- column-resident path: whole N in one block -------------------------
    max_td_resident = _round_down(budget // max(N * per_elem, 1), _LANE)
    if not force_streaming and max_td_resident >= _LANE:
        if tile_d is not None:
            td = _round_up(tile_d, _LANE)
        else:
            td = min(Dp, max_td_resident)
            # keep >= 2-4 lane tiles when D allows (pipelining + v7x megacore)
            if Dp >= 2 * _LANE:
                td = min(td, max(_round_down(Dp // 4, _LANE), _LANE))
        td = max(_round_down(min(td, Dp), _LANE), _LANE)
        return "resident", td, None

    # --- streaming path: bounded VMEM for any N -----------------------------
    td = _round_up(tile_d, _LANE) if tile_d is not None else min(Dp, 4 * _LANE)
    td = max(_round_down(min(td, Dp), _LANE), _LANE)
    if tile_n is not None:
        tn = max(_round_up(tile_n, _SUBLANE), _SUBLANE)
    else:
        tn = _round_down(budget // max(td * per_elem, 1), _SUBLANE)
        tn = min(max(tn, _SUBLANE), _round_up(N, _SUBLANE))
    return "stream", td, tn


# ---------------------------------------------------------------------------
# pallas_call wrappers.
# ---------------------------------------------------------------------------
def _softmax_resident(x, td, vmem_limit):
    N, D = x.shape
    itemsize = jnp.dtype(x.dtype).itemsize
    cost = pl.CostEstimate(
        flops=6 * N * D,                       # max-sub, sum, Newton, scale
        transcendentals=N * D,                 # exp
        bytes_accessed=2 * N * D * itemsize,   # read x + write out
    )
    return pl.pallas_call(
        _softmax_dim0_resident_kernel,
        out_shape=jax.ShapeDtypeStruct((N, D), x.dtype),
        grid=(D // td,),
        in_specs=[pl.BlockSpec((N, td), lambda j: (0, j))],
        out_specs=pl.BlockSpec((N, td), lambda j: (0, j)),
        compiler_params=pltpu.CompilerParams(
            dimension_semantics=("parallel",),
            vmem_limit_bytes=vmem_limit,
        ),
        cost_estimate=cost,
    )(x)


def _softmax_streaming(x, tn, td, vmem_limit):
    N, D = x.shape
    grid = (D // td, N // tn)

    # Pass 1: per-column running max / denominator (resident accumulators).
    m, denom = pl.pallas_call(
        _softmax_dim0_stats_kernel,
        out_shape=(jax.ShapeDtypeStruct((1, D), jnp.float32),
                   jax.ShapeDtypeStruct((1, D), jnp.float32)),
        grid=grid,
        in_specs=[pl.BlockSpec((tn, td), lambda j, i: (i, j))],
        out_specs=(pl.BlockSpec((1, td), lambda j, i: (0, j)),
                   pl.BlockSpec((1, td), lambda j, i: (0, j))),
        compiler_params=pltpu.CompilerParams(
            dimension_semantics=("parallel", "arbitrary"),
            vmem_limit_bytes=vmem_limit,
        ),
    )(x)

    # Pass 2: normalize.
    return pl.pallas_call(
        _softmax_dim0_normalize_kernel,
        out_shape=jax.ShapeDtypeStruct((N, D), x.dtype),
        grid=grid,
        in_specs=[pl.BlockSpec((tn, td), lambda j, i: (i, j)),
                  pl.BlockSpec((1, td), lambda j, i: (0, j)),
                  pl.BlockSpec((1, td), lambda j, i: (0, j))],
        out_specs=pl.BlockSpec((tn, td), lambda j, i: (i, j)),
        compiler_params=pltpu.CompilerParams(
            dimension_semantics=("parallel", "parallel"),
            vmem_limit_bytes=vmem_limit,
        ),
    )(x, m, denom)


def my_softmax(x, *, tile_n=None, tile_d=None, force_streaming=False):
    """exp(x) / sum(exp(x), dim=0) for a 2-D array x of shape (N, D)."""
    N, D = x.shape
    in_itemsize = jnp.dtype(x.dtype).itemsize
    out_itemsize = in_itemsize

    vmem_cap = _vmem_capacity_bytes()
    budget = (vmem_cap * 2) // 5        # ~40% of per-core VMEM for live tiles
    vmem_limit = (vmem_cap * 3) // 4    # raise default limit, keep headroom

    mode, td, tn = _plan(N, D, in_itemsize, out_itemsize, budget,
                         tile_n, tile_d, force_streaming)

    # Pad D up to a multiple of the lane-tile width (columns are independent,
    # zero-padded columns are sliced off): lane-dense, unmasked stores.
    Dp = _round_up(D, td)
    xp = x if Dp == D else jnp.pad(x, ((0, 0), (0, Dp - D)))

    if mode == "resident":
        out = _softmax_resident(xp, td, vmem_limit)
    else:
        # Pad N with a very negative value: exp underflows to 0, so padded
        # rows contribute nothing to the per-column sums.
        Np = _round_up(N, tn)
        if Np != N:
            xp = jnp.pad(xp, ((0, Np - N), (0, 0)), constant_values=-1e30)
        out = _softmax_streaming(xp, tn, td, vmem_limit)
        if Np != N:
            out = out[:N]

    if Dp != D:
        out = out[:, :D]
    return out


if __name__ == "__main__":
    key = jax.random.PRNGKey(0)
    # small shape consistent with the module: seq=8, hidden=32
    x = jax.random.normal(key, (8, 32), dtype=jnp.float32)

    out = jax.block_until_ready(my_softmax(x))
    ref = jnp.exp(x) / jnp.sum(jnp.exp(x), axis=0)
    assert out.shape == x.shape
    assert jnp.allclose(out, ref, atol=1e-5, rtol=1e-5)

    # Also exercise the streaming (large-N) path at a small shape.
    x2 = jax.random.normal(jax.random.PRNGKey(1), (64, 256), dtype=jnp.float32)
    out2 = jax.block_until_ready(
        my_softmax(x2, tile_n=16, tile_d=128, force_streaming=True))
    ref2 = jnp.exp(x2) / jnp.sum(jnp.exp(x2), axis=0)
    assert out2.shape == x2.shape
    assert jnp.allclose(out2, ref2, atol=1e-5, rtol=1e-5)

    print("KERNEL_OK")
</pallas_src>

<mosaic_0001>
module attributes {stable_mosaic.version = 11 : i64} {
  func.func @_softmax_dim0_resident_kernel(%arg0: i32, %arg1: memref<8x128xf32, #tpu.memory_space<vmem>>, %arg2: memref<8x128xf32, #tpu.memory_space<vmem>>) attributes {dimension_semantics = [#tpu.dimension_semantics<parallel>], iteration_bounds = array<i64: 1>, scalar_prefetch = 0 : i64, scratch_operands = 0 : i64, tpu.core_type = #tpu.core_type<tc>, window_params = [{transform_indices = @transform_0, window_bounds = array<i64: 8, 128>}, {transform_indices = @transform_1, window_bounds = array<i64: 8, 128>}]} {
    %c0 = arith.constant 0 : index
    %c0_0 = arith.constant 0 : index
    %0 = vector.load %arg1[%c0, %c0_0] : memref<8x128xf32, #tpu.memory_space<vmem>>, vector<8x128xf32>
    %cst = arith.constant dense<0xFF800000> : vector<128xf32>
    %1 = vector.multi_reduction <maximumf>, %0, %cst [0] : vector<8x128xf32> to vector<128xf32>
    %2 = vector.shape_cast %1 : vector<128xf32> to vector<1x128xf32>
    %3 = vector.broadcast %2 : vector<1x128xf32> to vector<8x128xf32>
    %4 = arith.subf %0, %3 : vector<8x128xf32>
    %5 = math.exp %4 : vector<8x128xf32>
    %cst_1 = arith.constant dense<0.000000e+00> : vector<128xf32>
    %6 = vector.multi_reduction <add>, %5, %cst_1 [0] : vector<8x128xf32> to vector<128xf32>
    %7 = vector.shape_cast %6 : vector<128xf32> to vector<1x128xf32>
    %8 = tpu.reciprocal %7 {approx = true} : vector<1x128xf32> -> vector<1x128xf32>
    %9 = arith.mulf %7, %8 : vector<1x128xf32>
    %cst_2 = arith.constant 2.000000e+00 : f32
    %10 = vector.broadcast %cst_2 : f32 to vector<1x128xf32>
    %11 = arith.subf %10, %9 : vector<1x128xf32>
    %12 = arith.mulf %8, %11 : vector<1x128xf32>
    %13 = vector.broadcast %12 : vector<1x128xf32> to vector<8x128xf32>
    %14 = arith.mulf %5, %13 : vector<8x128xf32>
    %c0_3 = arith.constant 0 : index
    %c0_4 = arith.constant 0 : index
    %15 = vector.load %arg2[%c0_3, %c0_4] : memref<8x128xf32, #tpu.memory_space<vmem>>, vector<8x128xf32>
    tpu.vector_store %arg2[%c0_3, %c0_4], %14 {strides = array<i32>} : memref<8x128xf32, #tpu.memory_space<vmem>>, vector<8x128xf32>,
    return
  }
  func.func @transform_0(%arg0: i32) -> (i32, i32) {
    %c0_i32 = arith.constant 0 : i32
    %c0_i32_0 = arith.constant 0 : i32
    return %c0_i32, %arg0 : i32, i32
  }
  func.func @transform_1(%arg0: i32) -> (i32, i32) {
    %c0_i32 = arith.constant 0 : i32
    %c0_i32_0 = arith.constant 0 : i32
    return %c0_i32, %arg0 : i32, i32
  }
}

</mosaic_0001>

<bundles_post_ra>
// kernel: tpu_custom_call.1
= control target key start
LH: loop header
LB: loop body
LE: loop exit
PB: predicated region body
PF: predicated region fallthrough
CT: control target
= control target key end

     0   :  { %6 = vsyncpa [#allocation3], 0  ;;  %s126_s0 = inlined_call_operand.hbm [shape: f32[8,128], index: 0, kind: input, shape index: {}]   ;;  %s127_s1 = inlined_call_operand.hbm [shape: f32[8,128], index: 1, kind: output, shape index: {}]  }
   0x1   :  { %7 = vsyncpa [#allocation4], 0  ;;  %s108_s6 = smov [#allocation2]  }
   0x2   :  { %s14_s7 = sshll.u32 %s108_s6, 4  ;;  %s15_s7 = int_to_ptr.vmem [resolvable:$true] %s14_s7 }
   0x3   :  { %s72_s8 = scalar_lea.vmem %s15_s7, 128  ;;  %p77_p1 = scmp.lt.s32.totalorder %s15_s7, %s15_s7 }
   0x4   :  { %p73_p0 = scmp.ne.s32.totalorder %s15_s7, %s72_s8  ;;  %p78_p2 = scmp.lt.s32.totalorder %s72_s8, %s72_s8 }
   0x6   :  { %p79_p3 = por %p78_p2, %p77_p1 }
   0x8   :  { %p80_p4 = pnand %p79_p3, %p73_p0 }
   0xa   :  { %83 = shalt.err (!%p80_p4)
}
   0xb   :  { %17 = dma.hbm_to_vmem [thread:$0]  %s126_s0, 128, %s15_s7, [#allocation3]  }
   0xc   :  { %104 = dma.done.wait [#allocation3], 128  }
   0xd   :  { %105 = vsyncadd [#allocation3], 4294967168  ;;  %v21_v0 = vld [vmem:[#allocation2] sm:$0xff]  ;;  %s109_s0 = smov [#allocation5]  }
   0xe   :  { %v22_v1 = vrot.slane %v21_v0, 4  ;;  %s49_s11 = sshll.u32 %s109_s0, 4  ;;  %s50_s11 = int_to_ptr.vmem [resolvable:$true] %s49_s11 }
   0xf   :  { %s84_s12 = scalar_lea.vmem %s50_s11, 128  ;;  %p89_p6 = scmp.lt.s32.totalorder %s50_s11, %s50_s11 }
  0x10   :  { %v23_v2 = vmax.f32 %v21_v0, %v22_v1  ;;  %p85_p5 = scmp.ne.s32.totalorder %s50_s11, %s84_s12  ;;  %p90_p7 = scmp.lt.s32.totalorder %s84_s12, %s84_s12 }
  0x12   :  { %v24_v3 = vrot.slane %v23_v2, 2  ;;  %p91_p8 = por %p90_p7, %p89_p6 }
  0x14   :  { %v25_v4 = vmax.f32 %v23_v2, %v24_v3  ;;  %p92_p9 = pnand %p91_p8, %p85_p5 }
  0x16   :  { %v26_v5 = vrot.slane %v25_v4, 1 }
  0x18   :  { %v27_v6 = vmax.f32 %v25_v4, %v26_v5 }
  0x1a   :  { %v28_v7 = vsub.f32 %v21_v0, %v27_v6 }
  0x1c   :  { %v29_v8 = vmul.f32 1.442695, %v28_v7 }
  0x1e   :  { %60 = vpow2.f32 %v29_v8 }
  0x2b   :  { %v61_v9 = vpop.eup %60 }
  0x2c   :  { %v31_v10 = vrot.slane %v61_v9, 4 }
  0x2e   :  { %v32_v11 = vadd.f32 %v61_v9, %v31_v10 }
  0x30   :  { %v33_v12 = vrot.slane %v32_v11, 2 }
  0x32   :  { %v34_v13 = vadd.f32 %v33_v12, %v32_v11 }
  0x34   :  { %v35_v14 = vrot.slane %v34_v13, 1 }
  0x36   :  { %v36_v15 = vadd.f32 %v35_v14, %v34_v13 }
  0x38   :  { %62 = vrcp.f32 %v36_v15 }
  0x45   :  { %v63_v16 = vpop.eup %62 }
  0x46   :  { %v38_v17 = vmul.f32 %v63_v16, %v36_v15 }
  0x48   :  { %v39_v18 = vsub.f32 2.0, %v38_v17 }
  0x4a   :  { %v40_v19 = vmul.f32 %v63_v16, %v39_v18 }
  0x4c   :  { %v41_v20 = vmul.f32 %v61_v9, %v40_v19 }
  0x4e   :  { %42 = vst [vmem:[#allocation5] sm:$0xff] %v41_v20 }
  0x4f   :  { %95 = shalt.err (!%p92_p9)
}
  0x50   :  { %52 = dma.vmem_to_hbm [thread:$0]  %s50_s11, 128, %s127_s1, [#allocation4]  }
  0x51   :  { %106 = dma.done.wait [#allocation4], 128  }
  0x52   :  { %107 = vsyncadd [#allocation4], 4294967168 }
  0x53   :  { %56 = vsyncpa [#allocation3], 1 }
  0x54   :  { %57 = vsyncpa [#allocation4], 1 }

</bundles_post_ra>
